<compile_context>
chip_gen: v7x
topology: tpu7x:2x2x1
jax: 0.10.0
libtpu: 0.0.40
codegen_flags: <defaults>
</compile_context>

<pallas_src>
import jax
import jax.numpy as jnp
from jax.experimental import pallas as pl
from jax.experimental.pallas import tpu as pltpu


ROWS_PER_STEP = 8  # output rows gathered per grid step (sublane-dense)


def _vmem_gather_kernel(labels_smem, table_ref, out_ref):
    """Whole table resident in VMEM; gather ROWS rows per grid step."""
    rows = out_ref.shape[0]
    base = pl.program_id(0) * rows
    for r in range(rows):                       # static, fully unrolled (rows is small)
        lbl = labels_smem[base + r]             # scalar read from SMEM
        out_ref[pl.ds(r, 1), :] = table_ref[pl.ds(lbl, 1), :]


def _dma_gather_kernel(labels_smem, table_hbm, out_ref, scratch, sems):
    """Table stays in HBM; ROWS overlapped row-DMAs per grid step."""
    rows = out_ref.shape[0]
    base = pl.program_id(0) * rows
    # Issue all row DMAs first (kept in flight together to hide HBM latency).
    for r in range(rows):
        lbl = labels_smem[base + r]
        pltpu.make_async_copy(table_hbm.at[pl.ds(lbl, 1), :],
                              scratch.at[pl.ds(r, 1), :],
                              sems.at[r]).start()
    # Wait for all of them, then one dense (rows, H_pad) store.
    for r in range(rows):
        lbl = labels_smem[base + r]
        pltpu.make_async_copy(table_hbm.at[pl.ds(lbl, 1), :],
                              scratch.at[pl.ds(r, 1), :],
                              sems.at[r]).wait()
    out_ref[...] = scratch[...]


def _tpu_vmem_capacity_bytes():
    try:
        return int(pltpu.get_tpu_info().vmem_capacity_bytes)
    except Exception:
        return 64 << 20  # conservative default (v7x per-TC VMEM)


def label_embed_forward(labels, table, *, num_classes, dropout_prob,
                        train=False, force_drop_ids=None, rng_key=None,
                        rows_per_step=ROWS_PER_STEP, force_dma_path=False):
    """JAX/Pallas equivalent of LabelEmbedder.forward(labels, train, force_drop_ids)."""
    B = labels.shape[0]
    V, H = table.shape

    # ---- token_drop (CFG label dropout) -- plain-JAX scalar glue ----
    use_dropout = dropout_prob > 0
    if (train and use_dropout) or (force_drop_ids is not None):
        if force_drop_ids is None:
            if rng_key is None:
                raise ValueError("rng_key is required when train=True and dropout_prob > 0")
            drop_ids = jax.random.uniform(rng_key, (B,)) < dropout_prob
        else:
            drop_ids = force_drop_ids == 1
        labels = jnp.where(drop_ids, num_classes, labels)
    # OOB guard: clamp to valid embedding rows.
    labels = jnp.clip(labels.astype(jnp.int32), 0, V - 1)

    # ---- pad for dense (8, 128)-aligned output tiles ----
    rows = max(8, int(rows_per_step))
    rows = ((rows + 7) // 8) * 8                      # sublane-dense
    H_pad = ((H + 127) // 128) * 128                  # lane-dense
    B_pad = ((B + rows - 1) // rows) * rows

    table_p = table if H_pad == H else jnp.pad(table, ((0, 0), (0, H_pad - H)))
    labels_p = labels if B_pad == B else jnp.pad(labels, (0, B_pad - B))

    grid = (B_pad // rows,)
    itemsize = jnp.dtype(table_p.dtype).itemsize
    tile_bytes = rows * H_pad * itemsize
    table_bytes = V * H_pad * itemsize

    # Whole-table-in-VMEM threshold (accounts for double-buffering + output tiles),
    # re-derived per chip (v7x has only 64 MiB physical VMEM vs 128 MiB on v5e/v6e).
    cap = _tpu_vmem_capacity_bytes()
    needed = 2 * table_bytes + 2 * tile_bytes + (1 << 20)
    use_vmem_path = (not force_dma_path) and (needed <= int(0.75 * cap))

    out_shape = jax.ShapeDtypeStruct((B_pad, H_pad), table_p.dtype)
    out_spec = pl.BlockSpec((rows, H_pad), lambda i, lbl: (i, 0))

    if use_vmem_path:
        vmem_limit = int(min(int(0.9 * cap), max(needed, 32 << 20)))
        out = pl.pallas_call(
            _vmem_gather_kernel,
            out_shape=out_shape,
            grid_spec=pltpu.PrefetchScalarGridSpec(
                num_scalar_prefetch=1,                 # labels -> SMEM
                grid=grid,
                in_specs=[
                    # full table, one big DMA, resident across all grid steps
                    pl.BlockSpec((V, H_pad), lambda i, lbl: (0, 0)),
                ],
                out_specs=out_spec,
            ),
            compiler_params=pltpu.CompilerParams(
                dimension_semantics=("parallel",),     # rows independent -> megacore OK
                vmem_limit_bytes=vmem_limit),
        )(labels_p, table_p)
    else:
        out = pl.pallas_call(
            _dma_gather_kernel,
            out_shape=out_shape,
            grid_spec=pltpu.PrefetchScalarGridSpec(
                num_scalar_prefetch=1,
                grid=grid,
                in_specs=[pl.BlockSpec(memory_space=pl.ANY)],  # table stays in HBM
                out_specs=out_spec,
                scratch_shapes=[
                    pltpu.VMEM((rows, H_pad), table_p.dtype),
                    pltpu.SemaphoreType.DMA((rows,)),
                ],
            ),
            compiler_params=pltpu.CompilerParams(
                dimension_semantics=("parallel",)),
        )(labels_p, table_p)

    # strip padding; torch: .unsqueeze(1) -> (B, 1, H)
    out = out[:B, :H]
    return out[:, None, :]


if __name__ == "__main__":
    key = jax.random.PRNGKey(0)
    k_table, k_labels, k_drop = jax.random.split(key, 3)

    # small deterministic synthetic config (nn.Embedding default init ~ N(0, 1))
    num_classes, hidden, dropout_prob = 16, 32, 0.1
    B = 10  # deliberately not a multiple of 8 to exercise batch padding
    table = jax.random.normal(k_table, (num_classes + 1, hidden), dtype=jnp.float32)
    labels = jax.random.randint(k_labels, (B,), 0, num_classes, dtype=jnp.int32)

    # --- eval-mode forward (no dropout), whole-table-in-VMEM fast path ---
    emb = label_embed_forward(labels, table, num_classes=num_classes,
                              dropout_prob=dropout_prob, train=False)
    emb = jax.block_until_ready(emb)
    assert emb.shape == (B, 1, hidden), emb.shape
    ref = table[labels][:, None, :]
    assert jnp.allclose(emb, ref), "embedding gather mismatch (VMEM path)"

    # --- same computation through the HBM DMA-gather fallback path ---
    emb_dma = label_embed_forward(labels, table, num_classes=num_classes,
                                  dropout_prob=dropout_prob, train=False,
                                  force_dma_path=True)
    emb_dma = jax.block_until_ready(emb_dma)
    assert jnp.allclose(emb_dma, ref), "embedding gather mismatch (DMA path)"

    # --- forward with force_drop_ids (CFG drop -> row num_classes) ---
    force = jnp.array([1, 0, 1, 0, 0, 0, 1, 0, 1, 0], dtype=jnp.int32)
    emb2 = label_embed_forward(labels, table, num_classes=num_classes,
                               dropout_prob=dropout_prob, train=True,
                               force_drop_ids=force, rng_key=k_drop)
    emb2 = jax.block_until_ready(emb2)
    ref2 = table[jnp.where(force == 1, num_classes, labels)][:, None, :]
    assert jnp.allclose(emb2, ref2), "embedding gather mismatch (CFG-drop path)"

    print("KERNEL_OK")
</pallas_src>

<mosaic_0001>
module attributes {stable_mosaic.version = 11 : i64} {
  func.func @_vmem_gather_kernel(%arg0: i32, %arg1: memref<16xi32, #tpu.memory_space<smem>>, %arg2: memref<17x128xf32, #tpu.memory_space<vmem>>, %arg3: memref<8x128xf32, #tpu.memory_space<vmem>>) attributes {dimension_semantics = [#tpu.dimension_semantics<parallel>], iteration_bounds = array<i64: 2>, scalar_prefetch = 1 : i64, scratch_operands = 0 : i64, tpu.core_type = #tpu.core_type<tc>, window_params = [{pipeline_mode = #tpu.pipeline_mode<synchronous>, transform_indices = @transform_0, window_bounds = array<i64: 17, 128>}, {transform_indices = @transform_1, window_bounds = array<i64: 8, 128>}]} {
    %c8_i32 = arith.constant 8 : i32
    %0 = arith.muli %arg0, %c8_i32 : i32
    %c0_i32 = arith.constant 0 : i32
    %1 = arith.addi %0, %c0_i32 : i32
    %2 = arith.index_cast %1 : i32 to index
    %3 = memref.load %arg1[%2] : memref<16xi32, #tpu.memory_space<smem>>
    %4 = arith.index_cast %3 : i32 to index
    %c0 = arith.constant 0 : index
    %5 = vector.load %arg2[%4, %c0] : memref<17x128xf32, #tpu.memory_space<vmem>>, vector<1x128xf32>
    %c0_0 = arith.constant 0 : index
    %c0_1 = arith.constant 0 : index
    %6 = vector.load %arg3[%c0_0, %c0_1] : memref<8x128xf32, #tpu.memory_space<vmem>>, vector<1x128xf32>
    tpu.vector_store %arg3[%c0_0, %c0_1], %5 {strides = array<i32>} : memref<8x128xf32, #tpu.memory_space<vmem>>, vector<1x128xf32>,
    %c1_i32 = arith.constant 1 : i32
    %7 = arith.addi %0, %c1_i32 : i32
    %8 = arith.index_cast %7 : i32 to index
    %9 = memref.load %arg1[%8] : memref<16xi32, #tpu.memory_space<smem>>
    %10 = arith.index_cast %9 : i32 to index
    %c0_2 = arith.constant 0 : index
    %11 = vector.load %arg2[%10, %c0_2] : memref<17x128xf32, #tpu.memory_space<vmem>>, vector<1x128xf32>
    %c1 = arith.constant 1 : index
    %c0_3 = arith.constant 0 : index
    %12 = vector.load %arg3[%c1, %c0_3] : memref<8x128xf32, #tpu.memory_space<vmem>>, vector<1x128xf32>
    tpu.vector_store %arg3[%c1, %c0_3], %11 {strides = array<i32>} : memref<8x128xf32, #tpu.memory_space<vmem>>, vector<1x128xf32>,
    %c2_i32 = arith.constant 2 : i32
    %13 = arith.addi %0, %c2_i32 : i32
    %14 = arith.index_cast %13 : i32 to index
    %15 = memref.load %arg1[%14] : memref<16xi32, #tpu.memory_space<smem>>
    %16 = arith.index_cast %15 : i32 to index
    %c0_4 = arith.constant 0 : index
    %17 = vector.load %arg2[%16, %c0_4] : memref<17x128xf32, #tpu.memory_space<vmem>>, vector<1x128xf32>
    %c2 = arith.constant 2 : index
    %c0_5 = arith.constant 0 : index
    %18 = vector.load %arg3[%c2, %c0_5] : memref<8x128xf32, #tpu.memory_space<vmem>>, vector<1x128xf32>
    tpu.vector_store %arg3[%c2, %c0_5], %17 {strides = array<i32>} : memref<8x128xf32, #tpu.memory_space<vmem>>, vector<1x128xf32>,
    %c3_i32 = arith.constant 3 : i32
    %19 = arith.addi %0, %c3_i32 : i32
    %20 = arith.index_cast %19 : i32 to index
    %21 = memref.load %arg1[%20] : memref<16xi32, #tpu.memory_space<smem>>
    %22 = arith.index_cast %21 : i32 to index
    %c0_6 = arith.constant 0 : index
    %23 = vector.load %arg2[%22, %c0_6] : memref<17x128xf32, #tpu.memory_space<vmem>>, vector<1x128xf32>
    %c3 = arith.constant 3 : index
    %c0_7 = arith.constant 0 : index
    %24 = vector.load %arg3[%c3, %c0_7] : memref<8x128xf32, #tpu.memory_space<vmem>>, vector<1x128xf32>
    tpu.vector_store %arg3[%c3, %c0_7], %23 {strides = array<i32>} : memref<8x128xf32, #tpu.memory_space<vmem>>, vector<1x128xf32>,
    %c4_i32 = arith.constant 4 : i32
    %25 = arith.addi %0, %c4_i32 : i32
    %26 = arith.index_cast %25 : i32 to index
    %27 = memref.load %arg1[%26] : memref<16xi32, #tpu.memory_space<smem>>
    %28 = arith.index_cast %27 : i32 to index
    %c0_8 = arith.constant 0 : index
    %29 = vector.load %arg2[%28, %c0_8] : memref<17x128xf32, #tpu.memory_space<vmem>>, vector<1x128xf32>
    %c4 = arith.constant 4 : index
    %c0_9 = arith.constant 0 : index
    %30 = vector.load %arg3[%c4, %c0_9] : memref<8x128xf32, #tpu.memory_space<vmem>>, vector<1x128xf32>
    tpu.vector_store %arg3[%c4, %c0_9], %29 {strides = array<i32>} : memref<8x128xf32, #tpu.memory_space<vmem>>, vector<1x128xf32>,
    %c5_i32 = arith.constant 5 : i32
    %31 = arith.addi %0, %c5_i32 : i32
    %32 = arith.index_cast %31 : i32 to index
    %33 = memref.load %arg1[%32] : memref<16xi32, #tpu.memory_space<smem>>
    %34 = arith.index_cast %33 : i32 to index
    %c0_10 = arith.constant 0 : index
    %35 = vector.load %arg2[%34, %c0_10] : memref<17x128xf32, #tpu.memory_space<vmem>>, vector<1x128xf32>
    %c5 = arith.constant 5 : index
    %c0_11 = arith.constant 0 : index
    %36 = vector.load %arg3[%c5, %c0_11] : memref<8x128xf32, #tpu.memory_space<vmem>>, vector<1x128xf32>
    tpu.vector_store %arg3[%c5, %c0_11], %35 {strides = array<i32>} : memref<8x128xf32, #tpu.memory_space<vmem>>, vector<1x128xf32>,
    %c6_i32 = arith.constant 6 : i32
    %37 = arith.addi %0, %c6_i32 : i32
    %38 = arith.index_cast %37 : i32 to index
    %39 = memref.load %arg1[%38] : memref<16xi32, #tpu.memory_space<smem>>
    %40 = arith.index_cast %39 : i32 to index
    %c0_12 = arith.constant 0 : index
    %41 = vector.load %arg2[%40, %c0_12] : memref<17x128xf32, #tpu.memory_space<vmem>>, vector<1x128xf32>
    %c6 = arith.constant 6 : index
    %c0_13 = arith.constant 0 : index
    %42 = vector.load %arg3[%c6, %c0_13] : memref<8x128xf32, #tpu.memory_space<vmem>>, vector<1x128xf32>
    tpu.vector_store %arg3[%c6, %c0_13], %41 {strides = array<i32>} : memref<8x128xf32, #tpu.memory_space<vmem>>, vector<1x128xf32>,
    %c7_i32 = arith.constant 7 : i32
    %43 = arith.addi %0, %c7_i32 : i32
    %44 = arith.index_cast %43 : i32 to index
    %45 = memref.load %arg1[%44] : memref<16xi32, #tpu.memory_space<smem>>
    %46 = arith.index_cast %45 : i32 to index
    %c0_14 = arith.constant 0 : index
    %47 = vector.load %arg2[%46, %c0_14] : memref<17x128xf32, #tpu.memory_space<vmem>>, vector<1x128xf32>
    %c7 = arith.constant 7 : index
    %c0_15 = arith.constant 0 : index
    %48 = vector.load %arg3[%c7, %c0_15] : memref<8x128xf32, #tpu.memory_space<vmem>>, vector<1x128xf32>
    tpu.vector_store %arg3[%c7, %c0_15], %47 {strides = array<i32>} : memref<8x128xf32, #tpu.memory_space<vmem>>, vector<1x128xf32>,
    return
  }
  func.func @transform_0(%arg0: i32, %arg1: memref<16xi32, #tpu.memory_space<smem>>) -> (i32, i32) {
    %c0_i32 = arith.constant 0 : i32
    %c0_i32_0 = arith.constant 0 : i32
    %c0_i32_1 = arith.constant 0 : i32
    return %c0_i32, %c0_i32_0 : i32, i32
  }
  func.func @transform_1(%arg0: i32, %arg1: memref<16xi32, #tpu.memory_space<smem>>) -> (i32, i32) {
    %c0_i32 = arith.constant 0 : i32
    %c0_i32_0 = arith.constant 0 : i32
    return %arg0, %c0_i32 : i32, i32
  }
}

</mosaic_0001>

<bundles_post_ra>
// kernel: tpu_custom_call.1
= control target key start
LH: loop header
LB: loop body
LE: loop exit
PB: predicated region body
PF: predicated region fallthrough
CT: control target
= control target key end

     0   :  { %s575_s0 = inlined_call_operand.hbm [shape: s32[16], index: 0, kind: input, shape index: {}]   ;;  %s576_s1 = inlined_call_operand.hbm [shape: f32[17,128], index: 1, kind: input, shape index: {}]   ;;  %s577_s2 = inlined_call_operand.hbm [shape: f32[16,128], index: 2, kind: output, shape index: {}]  }
   0x1   :  { %s300_s11 = scalar_lea.hbm %s575_s0, 16 }
   0x2   :  { %p301_p0 = scmp.ne.s32.totalorder %s575_s0, %s300_s11  ;;  %p304_p1 = scmp.lt.u32.totalorder %s300_s11, %s575_s0 }
   0x4   :  { %p306_p2 = pnand %p304_p1, %p301_p0 }
   0x6   :  { %309 = shalt.err (!%p306_p2)  }
   0x7   :  { %s408_s16 = smov [#allocation3]  }
   0x8   :  { %8 = dma.hbm_to_smem %s575_s0, 16, %s408_s16, [#allocation2] }
   0x9   :  { %382 = dma.done.wait [#allocation2], 16 }
   0xa   :  { %383 = vsyncadd [#allocation2], 4294967280 }
   0xb   :  { %10 = sfence }
   0xc   :  { %11 = vsyncpa [#allocation5], 0 }
   0xd   :  { %12 = vsyncpa [#allocation6], 0 }
   0xe   :  { %14 = vsyncpa [#allocation6 + $0x1], 0  ;;  %s440_s19 = smov 0   ;;  %s442_s20 = smov 0  }
   0xf   :  { %s444_s21 = smov 0   ;;  %s446_s22 = smov 0  }
  0x10 LB: > { %s461_s0 = sadd.s32 4294967295, %s406_s22   ;;  %s236_s23 = sadd.s32 4294967294, %s406_s22   ;;  %s406_s22 = sphi %s446_s22, %s595_s22   ;;  %s402_s21 = sphi %s444_s21, %s594_s21   ;;  %s398_s20 = sphi %s442_s20, %s593_s20   ;;  %s394_s19 = sphi %s440_s19, %s592_s19  }
  0x11   : > { %s465_s24 = sadd.s32 1, %s406_s22   ;;  %s48_s25 = sadd.s32 1, %s402_s21 }
  0x12   : > { %s45_s26 = ssub.s32 %s406_s22, %s465_s24  ;;  %p58_p3 = scmp.ne.s32.totalorder %s402_s21, %s398_s20 }
  0x13   : > { %p46_p4 = scmp.eq.s32.totalorder %s45_s26, 0  ;;  %p59_p5 = scmp.eq.s32.totalorder %s461_s0, 1 }
  0x14   : > { %p64_p6 = scmp.ne.s32.totalorder %s398_s20, %s394_s19  ;;  %p65_p7 = scmp.eq.s32.totalorder %s236_s23, 1 }
  0x15   : > { %s476_s27 = scalar_select %p46_p4, %s402_s21, %s48_s25  }
  0x16   : > { %p478_p8 = por %p59_p5, %p58_p3  ;;  %p482_p9 = por %p65_p7, %p64_p6 }
  0x17   : > { %p237_p10 = scmp.ge.s32.totalorder %s406_s22, 1  ;;  %p72_p11 = scmp.lt.s32.totalorder %s406_s22, 3 }
  0x18   : > { %s582_s28 = scalar_select %p478_p8, 1, 0 }
  0x19   : > { %s583_s29 = scalar_select %p482_p9, 1, 0 }
  0x1a   : > { %p578_p12 = scmp.eq.s32.totalorder %s461_s0, 0  ;;  %p489_p13 = pnand %p237_p10, %p72_p11 }
  0x1b   : > { %s409_s3 = smov [#allocation4]   ;;  %s310_s8 = scalar_lea.hbm %s576_s1, 384 }
  0x1c   : > { %s584_s30 = scalar_select %p489_p13, 1, 0 }
  0x1d   : > { %s84_s4 = sshll.u32 %s409_s3, 4  ;;  %p253_p0 = pneg %p489_p13  ;;  %s85_s4 = int_to_ptr.vmem [resolvable:$true] %s84_s4 }
  0x1e   : > { %p311_p2 = scmp.ne.s32.totalorder %s576_s1, %s310_s8  ;;  %p317_p6 = scmp.lt.u32.totalorder %s310_s8, %s576_s1 }
  0x1f   : > { %p497_p1 = pnand %p578_p12, %p253_p0 }
  0x21   : > { %p312_p3 = pneg %p497_p1 }
  0x23   : > { %p313_p4 = pnand %p312_p3, %p311_p2 }
  0x25   : > { %p314_p5 = pneg %p313_p4 }
  0x27   : > { %p319_p7 = pnand %p317_p6, %p314_p5 }
  0x29   : > { %322 = shalt.err (!%p319_p7)
}
  0x2a   : > { %s323_s13 = scalar_lea.vmem %s85_s4, 384  ;;  %p331_p12 = scmp.lt.s32.totalorder %s85_s4, %s85_s4 }
  0x2b   : > { %p324_p10 = scmp.ne.s32.totalorder %s85_s4, %s323_s13  ;;  %p332_p9 = scmp.lt.s32.totalorder %s323_s13, %s323_s13 }
  0x2d   : > { %p326_p11 = pnand %p324_p10, %p312_p3  ;;  %p333_p8 = por %p332_p9, %p331_p12 }
  0x2f   : > { %p327_p0 = pneg %p326_p11 }
  0x31   : > { %p334_p13 = pnand %p333_p8, %p327_p0 }
  0x33   : > { %337 = shalt.err (!%p334_p13)
}
  0x34   : > { %s410_s14 = smov 128   ;;  %s411_s15 = smov 8  }
  0x35   : > { %256 = dma.hbm_to_vmem [thread:$0]  (!%p497_p1), %s576_s1, 384, %s85_s4, [#allocation5], %s410_s14, %s410_s14, %s411_s15  }
  0x36   : > { %p586_p2 = scmp.ne.s32.totalorder %s584_s30, 0 }
  0x37   : > { %p587_p4 = scmp.eq.s32.totalorder (!%p586_p2), %s461_s0, 0 }
  0x38   : > { %100 = sbr.rel (%p586_p2) target bundleno = 103 (0x67), region = 24 }
  0x3f   : > { %385 = dma.done.wait (%p587_p4), [#allocation5], 384   ;;  %p588_p3 = pmov %p587_p4 }
  0x40   : > { %s581_s18 = sand.u32 1, %s398_s20   ;;  %s242_s23 = sshll.u32 %s461_s0, 3 }
  0x41   : > { %387 = vsyncadd (%p588_p3), [#allocation5], 4294966912  ;;  %s241_s25 = sshll.u32 %s581_s18, 3  ;;  %s116_s26 = sld [smem:[#allocation3 + %s242_s23]] }
  0x42   : > { %s120_s3 = sadd.s32 1, %s242_s23  ;;  %s125_s5 = sadd.s32 2, %s242_s23 }
  0x43   : > { %s121_s4 = sld [smem:[#allocation3 + %s120_s3]]  ;;  %s130_s30 = sadd.s32 3, %s242_s23 }
  0x44   : > { %s126_s6 = sld [smem:[#allocation3 + %s125_s5]]  ;;  %s135_s7 = sadd.s32 4, %s242_s23 }
  0x45   : > { %s131_s8 = sld [smem:[#allocation3 + %s130_s30]]  ;;  %s140_s10 = sadd.s32 5, %s242_s23 }
  0x46   : > { %s136_s9 = sld [smem:[#allocation3 + %s135_s7]]  ;;  %s145_s13 = sadd.s32 6, %s242_s23 }
  0x47   : > { %s117_s11 = scalar_lea.vmem [#allocation4], %s116_s26  ;;  %s141_s12 = sld [smem:[#allocation3 + %s140_s10]] }
  0x48   : > { %v118_v0 = vld [vmem:[%s117_s11] sm:$0x1]  ;;  %s114_s14 = scalar_lea.vmem [#allocation7], %s241_s25  ;;  %s146_s15 = sld [smem:[#allocation3 + %s145_s13]] }
  0x49   : > { %119 = vst [vmem:[%s114_s14] sm:$0x1] %v118_v0  ;;  %s150_s16 = sadd.s32 7, %s242_s23  ;;  %s122_s17 = scalar_lea.vmem [#allocation4], %s121_s4 }
  0x4a   : > { %v123_v1 = vld [vmem:[%s122_s17] sm:$0x1]  ;;  %s127_s18 = scalar_lea.vmem [#allocation4], %s126_s6  ;;  %s151_s3 = sld [smem:[#allocation3 + %s150_s16]] }
  0x4b   : > { %v128_v2 = vld [vmem:[%s127_s18] sm:$0x1]  ;;  %124 = vst [vmem:[%s114_s14 + $0x1] sm:$0x1] %v123_v1  ;;  %s132_s5 = scalar_lea.vmem [#allocation4], %s131_s8  ;;  %s244_s26 = sshll.u32 %s461_s0, 7 }
  0x4c   : > { %129 = vst [vmem:[%s114_s14 + $0x2] sm:$0x1] %v128_v2  ;;  %v133_v3 = vld [vmem:[%s132_s5] sm:$0x1]  ;;  %s137_s30 = scalar_lea.vmem [#allocation4], %s136_s9  ;;  %s169_s25 = sshll.u32 %s114_s14, 4  ;;  %s533_s25 = int_to_ptr.vmem [resolvable:$true] %s169_s25 }
  0x4d   : > { %v138_v4 = vld [vmem:[%s137_s30] sm:$0x1]  ;;  %134 = vst [vmem:[%s114_s14 + $0x3] sm:$0x1] %v133_v3  ;;  %s142_s7 = scalar_lea.vmem [#allocation4], %s141_s12  ;;  %s531_s6 = scalar_lea.hbm %s577_s2, %s244_s26 }
  0x4e   : > { %139 = vst [vmem:[%s114_s14 + $0x4] sm:$0x1] %v138_v4  ;;  %v143_v5 = vld [vmem:[%s142_s7] sm:$0x1]  ;;  %s147_s23 = scalar_lea.vmem [#allocation4], %s146_s15  ;;  %s589_s8 = sand.u32 1, %s398_s20  }
  0x4f   : > { %144 = vst [vmem:[%s114_s14 + $0x5] sm:$0x1] %v143_v5  ;;  %v148_v6 = vld [vmem:[%s147_s23] sm:$0x1]  ;;  %s156_s9 = scalar_lea.sflag [#allocation6], %s589_s8  ;;  %s338_s10 = scalar_lea.vmem %s533_s25, 128 }
  0x50   : > { %149 = vst [vmem:[%s114_s14 + $0x6] sm:$0x1] %v148_v6  ;;  %s152_s0 = scalar_lea.vmem [#allocation4], %s151_s3  ;;  %p339_p8 = scmp.ne.s32.totalorder %s533_s25, %s338_s10 }
  0x51   : > { %v153_v7 = vld [vmem:[%s152_s0] sm:$0x1]  ;;  %p590_p9 = scmp.ne.s32.totalorder %s582_s28, 0  ;;  %s412_s11 = smov [#allocation7]  }
  0x52   : > { %154 = vst [vmem:[%s114_s14 + $0x7] sm:$0x1] %v153_v7  ;;  %s342_s12 = sshll.u32 %s412_s11, 4  ;;  %s343_s12 = int_to_ptr.vmem [resolvable:$false] %s342_s12 }
  0x53   : > { %p340_p12 = pnand %p339_p8, %p590_p9  ;;  %s344_s13 = scalar_lea.vmem %s343_s12, 256 }
  0x54   : > { %p345_p1 = scmp.lt.s32.totalorder %s533_s25, %s343_s12  ;;  %p346_p5 = scmp.lt.s32.totalorder %s344_s13, %s338_s10 }
  0x55   : > { %p341_p13 = pneg %p340_p12 }
  0x56   : > { %p347_p6 = por %p346_p5, %p345_p1 }
  0x58   : > { %p348_p7 = pnand %p347_p6, %p341_p13 }
  0x5a   : > { %351 = shalt.err (!%p348_p7)
}
  0x5b   : > { %s352_s14 = scalar_lea.hbm %s531_s6, 128  ;;  %s356_s17 = scalar_lea.hbm %s577_s2, 256 }
  0x5c   : > { %p353_p10 = scmp.ne.s32.totalorder %s531_s6, %s352_s14  ;;  %p357_p2 = scmp.lt.u32.totalorder %s531_s6, %s577_s2 }
  0x5d   : > { %p358_p4 = scmp.lt.u32.totalorder %s356_s17, %s352_s14  ;;  %p360_p8 = scmp.lt.u32.totalorder %s352_s14, %s531_s6 }
  0x5e   : > { %p354_p11 = pnand %p353_p10, %p590_p9 }
  0x5f   : > { %p359_p3 = por %p358_p4, %p357_p2 }
  0x60   : > { %p355_p0 = pneg %p354_p11 }
  0x61   : > { %p361_p12 = por %p360_p8, %p359_p3 }
  0x63   : > { %p362_p13 = pnand %p361_p12, %p355_p0 }
  0x65   : > { %365 = shalt.err (!%p362_p13)
}
  0x66   : > { %251 = dma.vmem_to_hbm [thread:$0]  (%p590_p9), %s533_s25, 128, %s531_s6, %s156_s9  }
  0x67 PF: > { %p263_p1 = scmp.ge.s32.totalorder %s406_s22, 2  ;;  %s181_s30 = sand.u32 1, %s394_s19  }
  0x68   : > { %p591_p5 = scmp.ne.s32.totalorder %s583_s29, 0  ;;  %s182_s26 = scalar_lea.sflag [#allocation6], %s181_s30 }
  0x6a   : > { %p258_p6 = pnand %p263_p1, %p591_p5 }
  0x6c   : > { %389 = dma.done.wait (!%p258_p6), %s182_s26, 128  }
  0x6d   : > { %391 = vsyncadd (!%p258_p6), %s182_s26, 4294967168  ;;  %p17_p7 = scmp.ge.s32.totalorder %s465_s24, 4   ;;  %s592_s19 = smov %s398_s20 }
  0x6e   : > { %s593_s20 = smov %s402_s21  ;;  %s594_s21 = smov %s476_s27 }
  0x6f   : > { %s595_s22 = smov %s465_s24  ;;  %19 = sbr.rel (!%p17_p7) target bundleno = 16 (0x10), region = 69 }
  0x76   :  { %187 = vsyncpa [#allocation5], 1 }
  0x77   :  { %189 = vsyncpa [#allocation5 + $0x1], 1 }
  0x78   :  { %190 = vsyncpa [#allocation6], 1 }
  0x79   :  { %192 = vsyncpa [#allocation6 + $0x1], 1 }

</bundles_post_ra>
